<compile_context>
chip_gen: v6e
topology: v6e:2x2x1
jax: 0.10.0
libtpu: 0.0.40
codegen_flags: <defaults>
</compile_context>

<pallas_src>
import jax
import jax.numpy as jnp
from jax.experimental import pallas as pl
from jax.experimental.pallas import tpu as pltpu


def _copy_kernel(x_ref, o_ref):
    o_ref[...] = x_ref[...]


def _cdiv(a: int, b: int) -> int:
    return -(-a // b)


def _round_up(a: int, b: int) -> int:
    return _cdiv(a, b) * b


def lorl_forward(x: jax.Array) -> jax.Array:
    """Identity forward pass of `Lorl` as a tiled Pallas TPU copy kernel.

    Note: callers that do not need a distinct output buffer can simply use
    `x` directly (true zero-HBM-traffic identity); this kernel is for when a
    materialized copy is required.
    """
    if x.size == 0 or x.ndim == 0:
        return x

    shape = x.shape
    dtype = x.dtype
    total = int(x.size)
    itemsize = jnp.dtype(dtype).itemsize
    packing = max(1, 4 // itemsize)   # sublanes packed per 32-bit row
    SUB = 8 * packing                 # sublane multiple for this dtype

    # ---- Padding-free 2D view -------------------------------------------
    # Prefer a wide lane-dense width (multiple of 128) that divides the total
    # element count exactly; otherwise fall back to the array's own last dim
    # (block then uses the full width, which is always a legal block shape).
    cols = None
    for c in (2048, 1024, 512, 256, 128):
        if total % c == 0:
            cols = c
            break
    if cols is None:
        cols = int(shape[-1])
    rows = total // cols

    # ---- Row tiling -------------------------------------------------------
    # ~2 MiB tiles: double-buffered in + out is <= 8 MiB, safe under the
    # scoped-VMEM defaults on v5e (16 MiB) and v6e/v7x (32 MiB).
    target_tile_bytes = 2 * 1024 * 1024
    row_bytes = max(1, cols * itemsize)
    block_rows = max(SUB, (target_tile_bytes // row_bytes) // SUB * SUB)

    total_bytes = total * itemsize
    if total_bytes >= (1 << 20):
        # Ensure >= ~8 blocks on large arrays so the "parallel" grid axis
        # gives both v7x TensorCores (and their DMA issue paths) work.
        block_rows = min(block_rows, max(SUB, _round_up(_cdiv(rows, 8), SUB)))

    if rows <= block_rows:
        # Single block covering all rows; a full-extent dim is always legal.
        block_rows = rows

    grid = (pl.cdiv(rows, block_rows),)

    # Contiguous row-major reshape: free (bitcast), no pad, no post-slice.
    x2d = jnp.reshape(x, (rows, cols))

    out2d = pl.pallas_call(
        _copy_kernel,
        out_shape=jax.ShapeDtypeStruct((rows, cols), dtype),
        grid=grid,
        in_specs=[pl.BlockSpec((block_rows, cols), lambda i: (i, 0))],
        out_specs=pl.BlockSpec((block_rows, cols), lambda i: (i, 0)),
        compiler_params=pltpu.CompilerParams(
            dimension_semantics=("parallel",),   # megacore sharding on v7x
        ),
        cost_estimate=pl.CostEstimate(
            flops=0,
            transcendentals=0,
            bytes_accessed=2 * total * itemsize,   # true (unpadded) bytes
        ),
    )(x2d)

    return jnp.reshape(out2d, shape)


if __name__ == "__main__":
    key = jax.random.PRNGKey(0)

    # Small NCHW image-like input, consistent with an object-centric learner.
    x = jax.random.normal(key, (2, 4, 16, 16), dtype=jnp.float32)
    y = jax.block_until_ready(lorl_forward(x))
    assert y.shape == x.shape, (y.shape, x.shape)
    assert y.dtype == x.dtype, (y.dtype, x.dtype)
    assert bool(jnp.all(y == x)), "identity forward mismatch (f32 NCHW)"

    # Ragged shape (element count not a multiple of 128) exercises the
    # full-width fallback path.
    k2, k3 = jax.random.split(key)
    x2 = jax.random.normal(k2, (3, 5, 7), dtype=jnp.float32)
    y2 = jax.block_until_ready(lorl_forward(x2))
    assert y2.shape == x2.shape and y2.dtype == x2.dtype
    assert bool(jnp.all(y2 == x2)), "identity forward mismatch (ragged f32)"

    # Larger bf16 input exercises the multi-block (parallel grid) path with
    # dtype-aware sublane rounding.
    x3 = jax.random.normal(k3, (8, 384, 512), dtype=jnp.bfloat16)
    y3 = jax.block_until_ready(lorl_forward(x3))
    assert y3.shape == x3.shape and y3.dtype == x3.dtype
    assert bool(jnp.all(y3 == x3)), "identity forward mismatch (bf16 multi-block)"

    print("KERNEL_OK")
</pallas_src>

<mosaic_0001>
module attributes {stable_mosaic.version = 11 : i64} {
  func.func @_copy_kernel(%arg0: i32, %arg1: memref<1x2048xf32, #tpu.memory_space<vmem>>, %arg2: memref<1x2048xf32, #tpu.memory_space<vmem>>) attributes {dimension_semantics = [#tpu.dimension_semantics<parallel>], iteration_bounds = array<i64: 1>, scalar_prefetch = 0 : i64, scratch_operands = 0 : i64, tpu.core_type = #tpu.core_type<tc>, window_params = [{transform_indices = @transform_0, window_bounds = array<i64: 1, 2048>}, {transform_indices = @transform_1, window_bounds = array<i64: 1, 2048>}]} {
    %c0 = arith.constant 0 : index
    %c0_0 = arith.constant 0 : index
    %0 = vector.load %arg1[%c0, %c0_0] : memref<1x2048xf32, #tpu.memory_space<vmem>>, vector<1x2048xf32>
    %c0_1 = arith.constant 0 : index
    %c0_2 = arith.constant 0 : index
    %1 = vector.load %arg2[%c0_1, %c0_2] : memref<1x2048xf32, #tpu.memory_space<vmem>>, vector<1x2048xf32>
    tpu.vector_store %arg2[%c0_1, %c0_2], %0 {strides = array<i32>} : memref<1x2048xf32, #tpu.memory_space<vmem>>, vector<1x2048xf32>,
    return
  }
  func.func @transform_0(%arg0: i32) -> (i32, i32) {
    %c0_i32 = arith.constant 0 : i32
    %c0_i32_0 = arith.constant 0 : i32
    return %arg0, %c0_i32 : i32, i32
  }
  func.func @transform_1(%arg0: i32) -> (i32, i32) {
    %c0_i32 = arith.constant 0 : i32
    %c0_i32_0 = arith.constant 0 : i32
    return %arg0, %c0_i32 : i32, i32
  }
}

</mosaic_0001>

<bundles_post_ra>
// kernel: tpu_custom_call.1
= control target key start
LH: loop header
LB: loop body
LE: loop exit
PB: predicated region body
PF: predicated region fallthrough
CT: control target
= control target key end

     0   :  { %6 = vsyncpa [#allocation3], 0  ;;  %s104_s0 = inlined_call_operand.hbm [shape: f32[1,2048], index: 0, kind: input, shape index: {}]   ;;  %s105_s1 = inlined_call_operand.hbm [shape: f32[1,2048], index: 1, kind: output, shape index: {}]  }
   0x1   :  { %7 = vsyncpa [#allocation4], 0  ;;  %s86_s6 = smov [#allocation2]  }
   0x2   :  { %s14_s7 = sshll.u32 %s86_s6, 4  ;;  %s15_s7 = int_to_ptr.vmem [resolvable:$true] %s14_s7 }
   0x3   :  { %s50_s8 = scalar_lea.vmem %s15_s7, 256  ;;  %p55_p1 = scmp.lt.s32.totalorder %s15_s7, %s15_s7 }
   0x4   :  { %p51_p0 = scmp.ne.s32.totalorder %s15_s7, %s50_s8  ;;  %p56_p2 = scmp.lt.s32.totalorder %s50_s8, %s50_s8 }
   0x6   :  { %p57_p3 = por %p56_p2, %p55_p1 }
   0x8   :  { %p58_p4 = pnand %p57_p3, %p51_p0 }
   0xa   :  { %61 = shalt.err (!%p58_p4)
}
   0xb   :  { %17 = dma.hbm_to_vmem [thread:$0]  %s104_s0, 256, %s15_s7, [#allocation3]  }
   0xc   :  { %82 = dma.done.wait [#allocation3], 256  }
   0xd   :  { %83 = vsyncadd [#allocation3], 4294967040  ;;  %s87_s11 = smov [#allocation5]   ;;  %v21_v0 = vld [vmem:[#allocation2] sm:$0xff]  ;;  %v22_v1 = vld [vmem:[#allocation2 + $0x8] sm:$0xff] }
   0xe   :  { %s31_s12 = sshll.u32 %s87_s11, 4  ;;  %23 = vst [vmem:[#allocation5] sm:$0xff] %v21_v0  ;;  %24 = vst [vmem:[#allocation5 + $0x8] sm:$0xff] %v22_v1  ;;  %s32_s12 = int_to_ptr.vmem [resolvable:$true] %s31_s12 }
   0xf   :  { %s62_s13 = scalar_lea.vmem %s32_s12, 256  ;;  %p67_p6 = scmp.lt.s32.totalorder %s32_s12, %s32_s12 }
  0x10   :  { %p63_p5 = scmp.ne.s32.totalorder %s32_s12, %s62_s13  ;;  %p68_p7 = scmp.lt.s32.totalorder %s62_s13, %s62_s13 }
  0x12   :  { %p69_p8 = por %p68_p7, %p67_p6 }
  0x14   :  { %p70_p9 = pnand %p69_p8, %p63_p5 }
  0x16   :  { %73 = shalt.err (!%p70_p9)
}
  0x17   :  { %34 = dma.vmem_to_hbm [thread:$0]  %s32_s12, 256, %s105_s1, [#allocation4]  }
  0x18   :  { %84 = dma.done.wait [#allocation4], 256  }
  0x19   :  { %85 = vsyncadd [#allocation4], 4294967040 }
  0x1a   :  { %38 = vsyncpa [#allocation3], 1 }
  0x1b   :  { %39 = vsyncpa [#allocation4], 1 }

</bundles_post_ra>
